<compile_context>
chip_gen: v7x
topology: tpu7x:2x2x1
jax: 0.10.0
libtpu: 0.0.40
codegen_flags: <defaults>
</compile_context>

<pallas_src>
import functools

import jax
import jax.numpy as jnp
from jax import lax
from jax.experimental import pallas as pl
from jax.experimental.pallas import tpu as pltpu

_SUBLANE = 16  # bf16 sublane packing tile


def _round_up(x, m):
    return (x + m - 1) // m * m


def _basic_block_kernel(xc_ref, xr_ref, cm_ref, rm_ref,
                        w1_ref, b1_ref, w2_ref, b2_ref, out_ref,
                        *, W, tile_h):
    """One (image, row-tile) pair per grid step.

    xc_ref : (1, Cpad, (H+4)*W + 2) bf16  zero-padded image (2 pad rows each
                                          side, 1 guard element each end),
                                          flattened spatial on lanes
    xr_ref : (1, C, tile_h*W)       bf16  residual tile (original rows)
    cm_ref : (2, (tile_h+2)*W)      bf16  column-border masks (dw = -1 / +1)
    rm_ref : (1, 1, (tile_h+2)*W)   bf16  row-validity mask for this tile
    w1_ref : (Ppad, 9*Cpad)         bf16  conv1 weights * bn1 scale (tap major)
    b1_ref : (Ppad, 1)              f32   folded bn1 bias
    w2_ref : (P, 9*Ppad)            bf16  conv2 weights * bn2 scale
    b2_ref : (P, 1)                 f32   folded bn2 bias
    out_ref: (1, P, tile_h*W)             output tile
    """
    t = pl.program_id(1)
    Lout = tile_h * W                 # output lanes of this tile
    L2 = (tile_h + 2) * W             # y1 slab (tile rows + 1 halo row each side)
    L1 = (tile_h + 4) * W + 2         # x slab (+2 halo rows, +1 guard each end)

    m_left = cm_ref[0:1, :]           # (1, L2): column > 0      (taps dw = -1)
    m_right = cm_ref[1:2, :]          # (1, L2): column < W - 1  (taps dw = +1)

    def im2col(slab, length):
        """slab: (Cin, length + 2*W + 2) bf16 extended slab.

        Tap (dh, dw) of output index o is slab[o + (1+dh)*W + dw + 1].
        Out-of-row reads are true zeros (pad rows / zeroed halo rows / guard
        elements); out-of-column reads are killed by the bf16 border masks.
        Returns the (9*Cin, length) bf16 im2col matrix (tap-major rows).
        """
        pieces = []
        for dh in (-1, 0, 1):
            for dw in (-1, 0, 1):
                s = (1 + dh) * W + dw + 1          # static slice start
                piece = slab[:, s:s + length]
                if dw == -1:
                    piece = piece * m_left[:, :length]
                elif dw == 1:
                    piece = piece * m_right[:, :length]
                pieces.append(piece)
        return jnp.concatenate(pieces, axis=0)

    # ---- conv1 (bn1 scale folded into weights) -> +bias -> relu -------------
    start = pl.multiple_of(t * Lout, 128)          # tile picker guarantees this
    x_slab = xc_ref[0, :, pl.ds(start, L1)]        # (Cpad, L1) bf16
    y1 = jnp.dot(w1_ref[...], im2col(x_slab, L2),
                 preferred_element_type=jnp.float32)        # (Ppad, L2) f32
    y1 = jnp.maximum(y1 + b1_ref[...], 0.0)
    # Halo rows outside the image must act as SAME zero padding for conv2; the
    # precomputed row mask zeroes them (only the first / last row tile).
    y1 = (y1 * rm_ref[0]).astype(jnp.bfloat16)               # (Ppad, L2) bf16

    # ---- conv2 (bn2 scale folded) -> +bias -> +residual -> relu -------------
    guard = jnp.zeros((y1.shape[0], 1), jnp.bfloat16)
    y1_ext = jnp.concatenate([guard, y1, guard], axis=1)     # (Ppad, L2 + 2)
    y2 = jnp.dot(w2_ref[...], im2col(y1_ext, Lout),
                 preferred_element_type=jnp.float32)         # (P, Lout) f32
    y2 = y2 + b2_ref[...] + xr_ref[0].astype(jnp.float32)
    out_ref[0] = jnp.maximum(y2, 0.0).astype(out_ref.dtype)


def _fold_bn(bn, eps):
    s = (bn['gamma'] / jnp.sqrt(bn['running_var'] + eps)).astype(jnp.float32)
    b = (bn['beta'] - bn['running_mean'] * s).astype(jnp.float32)
    return s, b


def _fold_conv_weight(w_oihw, cin_pad, cout_pad):
    """(Cout, Cin, 3, 3) -> (cout_pad, 9*cin_pad) bf16, tap-major (kh, kw, c)."""
    co, ci, kh, kw = w_oihw.shape
    w = jnp.pad(w_oihw, ((0, cout_pad - co), (0, cin_pad - ci), (0, 0), (0, 0)))
    w = jnp.transpose(w, (0, 2, 3, 1)).reshape(cout_pad, kh * kw * cin_pad)
    return w.astype(jnp.bfloat16)


def _pick_tile_h(H, W, cin_pad, cout_pad, budget_bytes=8 * 2**20):
    """Largest lane-aligned row tile whose per-tile working set fits the budget."""
    def tile_bytes(th):
        lo, l2, l1 = th * W, (th + 2) * W, (th + 4) * W + 2
        return 2 * (9 * cin_pad * l2 + 9 * cout_pad * lo
                    + cin_pad * l1 + 4 * cout_pad * l2)
    cands = [th for th in range(1, H + 1)
             if H % th == 0 and (th == H or (th * W) % 128 == 0)]
    under = [th for th in cands if tile_bytes(th) <= budget_bytes]
    return max(under) if under else min(cands)


def basic_block_pallas(x_nchw, w1_oihw, bn1, w2_oihw, bn2, eps=1e-5,
                       tile_h=None):
    """x_nchw: (N, C, H, W).  w*_oihw: (P, C, 3, 3).  bn*: dicts with
    gamma/beta/running_mean/running_var of shape (P,) (inference-mode BN)."""
    N, C, H, W = x_nchw.shape
    P = w1_oihw.shape[0]
    assert C == P, "residual add requires inplanes == planes (downsample=None)"
    HW = H * W

    Cpad = _round_up(C, _SUBLANE)
    Ppad = _round_up(P, _SUBLANE)

    if tile_h is None:
        tile_h = _pick_tile_h(H, W, Cpad, Ppad)
    assert H % tile_h == 0
    assert tile_h == H or (tile_h * W) % 128 == 0, \
        "row tiles must be 128-lane aligned"
    T = H // tile_h
    Lout = tile_h * W
    L2 = (tile_h + 2) * W
    Lconv = (H + 4) * W + 2

    # Conv input: bf16, channels padded to the bf16 sublane tile, 2 zero rows
    # of SAME padding above/below, 1 guard element at each end of the flat
    # spatial axis (read only at masked corner-tap positions).
    x_pad = jnp.pad(x_nchw.astype(jnp.bfloat16),
                    ((0, 0), (0, Cpad - C), (2, 2), (0, 0)))
    x_conv = jnp.pad(x_pad.reshape(N, Cpad, (H + 4) * W),
                     ((0, 0), (0, 0), (1, 1)))
    # Residual input: lane-dense row tiles of the original image.
    x_res = x_nchw.reshape(N, C, HW).astype(jnp.bfloat16)

    # Grid-invariant masks: built once on the host, DMA'd once (no in-kernel
    # div/mod by W).
    col = jnp.arange(L2, dtype=jnp.int32) % W
    col_mask = jnp.stack([col > 0, col < W - 1]).astype(jnp.bfloat16)  # (2, L2)
    r = (jnp.arange(T, dtype=jnp.int32)[:, None] * tile_h - 1
         + jnp.arange(tile_h + 2, dtype=jnp.int32)[None, :])
    row_mask = jnp.repeat(((r >= 0) & (r < H)).astype(jnp.bfloat16),
                          W, axis=1).reshape(T, 1, L2)                 # (T,1,L2)

    # Fold BN (inference form) scales into the conv weights; only biases stay
    # in the kernel.
    s1, b1 = _fold_bn(bn1, eps)
    s2, b2 = _fold_bn(bn2, eps)
    w1f = _fold_conv_weight(w1_oihw * s1[:, None, None, None], Cpad, Ppad)
    w2f = _fold_conv_weight(w2_oihw * s2[:, None, None, None], Ppad, P)
    b1v = jnp.pad(b1, (0, Ppad - P)).reshape(Ppad, 1)
    b2v = b2.reshape(P, 1)

    # Scoped-VMEM budget from the actual tile sizes (raises v5e's 16 MiB
    # default; stays <= v7x's 64 MiB physical VMEM).
    est = 2 * (Cpad * Lconv * 2 + C * Lout * 2 + 2 * L2 * 2 + L2 * 2
               + Ppad * 9 * Cpad * 2 + Ppad * 4 + P * 9 * Ppad * 2 + P * 4
               + P * Lout * 4)
    est += (Cpad * ((tile_h + 4) * W + 2) * 2 + 9 * Cpad * L2 * 2
            + Ppad * L2 * 8 + 9 * Ppad * Lout * 2 + 2 * P * Lout * 4)
    vmem_limit = int(min(64 * 2**20, max(32 * 2**20, 4 * est)))

    kernel = functools.partial(_basic_block_kernel, W=W, tile_h=tile_h)

    out_flat = pl.pallas_call(
        kernel,
        out_shape=jax.ShapeDtypeStruct((N, P, HW), x_nchw.dtype),
        grid_spec=pltpu.PrefetchScalarGridSpec(
            num_scalar_prefetch=0,
            grid=(N, T),
            in_specs=[
                pl.BlockSpec((1, Cpad, Lconv), lambda n, t: (n, 0, 0)),  # x_conv
                pl.BlockSpec((1, C, Lout), lambda n, t: (n, 0, t)),      # x_res
                pl.BlockSpec((2, L2), lambda n, t: (0, 0)),              # col masks
                pl.BlockSpec((1, 1, L2), lambda n, t: (t, 0, 0)),        # row mask
                pl.BlockSpec((Ppad, 9 * Cpad), lambda n, t: (0, 0)),     # w1
                pl.BlockSpec((Ppad, 1), lambda n, t: (0, 0)),            # b1
                pl.BlockSpec((P, 9 * Ppad), lambda n, t: (0, 0)),        # w2
                pl.BlockSpec((P, 1), lambda n, t: (0, 0)),               # b2
            ],
            out_specs=pl.BlockSpec((1, P, Lout), lambda n, t: (n, 0, t)),
        ),
        compiler_params=pltpu.CompilerParams(
            dimension_semantics=("parallel", "parallel"),
            vmem_limit_bytes=vmem_limit),
    )(x_conv, x_res, col_mask, row_mask, w1f, b1v, w2f, b2v)

    return out_flat.reshape(N, P, H, W)


def basic_block_ref(x_nchw, w1_oihw, bn1, w2_oihw, bn2, eps=1e-5):
    """Pure-JAX f32 reference (inference-mode BatchNorm)."""
    def conv(x, w):
        return lax.conv_general_dilated(
            x, w, window_strides=(1, 1), padding='SAME',
            dimension_numbers=('NCHW', 'OIHW', 'NCHW'))

    def bn(x, p):
        s = p['gamma'] / jnp.sqrt(p['running_var'] + eps)
        b = p['beta'] - p['running_mean'] * s
        return x * s[None, :, None, None] + b[None, :, None, None]

    out = jnp.maximum(bn(conv(x_nchw, w1_oihw), bn1), 0.0)
    out = bn(conv(out, w2_oihw), bn2) + x_nchw
    return jnp.maximum(out, 0.0)


def _make_inputs(key, N, C, H, W):
    ks = jax.random.split(key, 8)
    x = jax.random.normal(ks[0], (N, C, H, W), jnp.float32)
    w1 = jax.random.normal(ks[1], (C, C, 3, 3), jnp.float32) * 0.1
    w2 = jax.random.normal(ks[2], (C, C, 3, 3), jnp.float32) * 0.1
    bn1 = dict(
        gamma=1.0 + 0.1 * jax.random.normal(ks[3], (C,), jnp.float32),
        beta=0.1 * jax.random.normal(ks[4], (C,), jnp.float32),
        running_mean=0.05 * jax.random.normal(ks[5], (C,), jnp.float32),
        running_var=jnp.abs(1.0 + 0.1 * jax.random.normal(ks[6], (C,), jnp.float32)),
    )
    bn2 = dict(
        gamma=1.0 + 0.1 * jax.random.normal(ks[7], (C,), jnp.float32),
        beta=jnp.linspace(-0.1, 0.1, C, dtype=jnp.float32),
        running_mean=jnp.linspace(-0.05, 0.05, C, dtype=jnp.float32),
        running_var=jnp.linspace(0.9, 1.1, C, dtype=jnp.float32),
    )
    return x, w1, bn1, w2, bn2


if __name__ == "__main__":
    key = jax.random.PRNGKey(0)
    k1, k2 = jax.random.split(key)

    # Case 1: N=2, C=4, 16x16 with explicit row tiling (T=2) -> exercises the
    # 2-row halo path, lane-aligned 128-lane tiles and the channel padding.
    args1 = _make_inputs(k1, 2, 4, 16, 16)
    out1 = jax.block_until_ready(basic_block_pallas(*args1, tile_h=8))
    ref1 = jax.block_until_ready(basic_block_ref(*args1))
    assert out1.shape == ref1.shape
    err1 = float(jnp.max(jnp.abs(out1 - ref1)))
    # bf16 MXU operands (f32 accumulation) + bf16 residual -> loose tolerance.
    assert jnp.allclose(out1, ref1, atol=5e-2, rtol=5e-2), f"max abs err {err1}"

    # Case 2: odd channel count, non-power-of-two W, single (unaligned) tile.
    args2 = _make_inputs(k2, 1, 5, 12, 24)
    out2 = jax.block_until_ready(basic_block_pallas(*args2))
    ref2 = jax.block_until_ready(basic_block_ref(*args2))
    err2 = float(jnp.max(jnp.abs(out2 - ref2)))
    assert jnp.allclose(out2, ref2, atol=5e-2, rtol=5e-2), f"max abs err {err2}"

    print("KERNEL_OK")
</pallas_src>

<mosaic_0001>
module attributes {stable_mosaic.version = 11 : i64} {
  func.func @_basic_block_kernel(%arg0: i32, %arg1: i32, %arg2: memref<1x16x322xbf16, #tpu.memory_space<vmem>>, %arg3: memref<1x4x128xbf16, #tpu.memory_space<vmem>>, %arg4: memref<2x160xbf16, #tpu.memory_space<vmem>>, %arg5: memref<1x1x160xbf16, #tpu.memory_space<vmem>>, %arg6: memref<16x144xbf16, #tpu.memory_space<vmem>>, %arg7: memref<16x1xf32, #tpu.memory_space<vmem>>, %arg8: memref<4x144xbf16, #tpu.memory_space<vmem>>, %arg9: memref<4x1xf32, #tpu.memory_space<vmem>>, %arg10: memref<1x4x128xf32, #tpu.memory_space<vmem>>) attributes {dimension_semantics = [#tpu.dimension_semantics<parallel>, #tpu.dimension_semantics<parallel>], iteration_bounds = array<i64: 2, 2>, scalar_prefetch = 0 : i64, scratch_operands = 0 : i64, tpu.core_type = #tpu.core_type<tc>, window_params = [{transform_indices = @transform_0, window_bounds = array<i64: 1, 16, 322>}, {transform_indices = @transform_1, window_bounds = array<i64: 1, 4, 128>}, {pipeline_mode = #tpu.pipeline_mode<synchronous>, transform_indices = @transform_2, window_bounds = array<i64: 2, 160>}, {transform_indices = @transform_3, window_bounds = array<i64: 1, 1, 160>}, {pipeline_mode = #tpu.pipeline_mode<synchronous>, transform_indices = @transform_4, window_bounds = array<i64: 16, 144>}, {pipeline_mode = #tpu.pipeline_mode<synchronous>, transform_indices = @transform_5, window_bounds = array<i64: 16, 1>}, {pipeline_mode = #tpu.pipeline_mode<synchronous>, transform_indices = @transform_6, window_bounds = array<i64: 4, 144>}, {pipeline_mode = #tpu.pipeline_mode<synchronous>, transform_indices = @transform_7, window_bounds = array<i64: 4, 1>}, {transform_indices = @transform_8, window_bounds = array<i64: 1, 4, 128>}]} {
    %c0 = arith.constant 0 : index
    %c0_0 = arith.constant 0 : index
    %0 = vector.load %arg4[%c0, %c0_0] : memref<2x160xbf16, #tpu.memory_space<vmem>>, vector<1x160xbf16>
    %c1 = arith.constant 1 : index
    %c0_1 = arith.constant 0 : index
    %1 = vector.load %arg4[%c1, %c0_1] : memref<2x160xbf16, #tpu.memory_space<vmem>>, vector<1x160xbf16>
    %c128_i32 = arith.constant 128 : i32
    %2 = arith.muli %arg1, %c128_i32 : i32
    %3 = tpu.assume_multiple %2, 128 : i32
    %c0_2 = arith.constant 0 : index
    %c0_3 = arith.constant 0 : index
    %4 = arith.index_cast %3 : i32 to index
    %5 = vector.load %arg2[%c0_2, %c0_3, %4] : memref<1x16x322xbf16, #tpu.memory_space<vmem>>, vector<1x16x194xbf16>
    %6 = vector.shape_cast %5 : vector<1x16x194xbf16> to vector<16x194xbf16>
    %c0_4 = arith.constant 0 : index
    %c0_5 = arith.constant 0 : index
    %7 = vector.load %arg6[%c0_4, %c0_5] : memref<16x144xbf16, #tpu.memory_space<vmem>>, vector<16x144xbf16>
    %8 = vector.extract_strided_slice %6 {offsets = [0, 0], sizes = [16, 160], strides = [1, 1]} : vector<16x194xbf16> to vector<16x160xbf16>
    %9 = vector.broadcast %0 : vector<1x160xbf16> to vector<16x160xbf16>
    %10 = arith.mulf %8, %9 : vector<16x160xbf16>
    %11 = vector.extract_strided_slice %6 {offsets = [0, 1], sizes = [16, 160], strides = [1, 1]} : vector<16x194xbf16> to vector<16x160xbf16>
    %12 = vector.extract_strided_slice %6 {offsets = [0, 2], sizes = [16, 160], strides = [1, 1]} : vector<16x194xbf16> to vector<16x160xbf16>
    %13 = vector.broadcast %1 : vector<1x160xbf16> to vector<16x160xbf16>
    %14 = arith.mulf %12, %13 : vector<16x160xbf16>
    %15 = vector.extract_strided_slice %6 {offsets = [0, 16], sizes = [16, 160], strides = [1, 1]} : vector<16x194xbf16> to vector<16x160xbf16>
    %16 = vector.broadcast %0 : vector<1x160xbf16> to vector<16x160xbf16>
    %17 = arith.mulf %15, %16 : vector<16x160xbf16>
    %18 = vector.extract_strided_slice %6 {offsets = [0, 17], sizes = [16, 160], strides = [1, 1]} : vector<16x194xbf16> to vector<16x160xbf16>
    %19 = vector.extract_strided_slice %6 {offsets = [0, 18], sizes = [16, 160], strides = [1, 1]} : vector<16x194xbf16> to vector<16x160xbf16>
    %20 = vector.broadcast %1 : vector<1x160xbf16> to vector<16x160xbf16>
    %21 = arith.mulf %19, %20 : vector<16x160xbf16>
    %22 = vector.extract_strided_slice %6 {offsets = [0, 32], sizes = [16, 160], strides = [1, 1]} : vector<16x194xbf16> to vector<16x160xbf16>
    %23 = vector.broadcast %0 : vector<1x160xbf16> to vector<16x160xbf16>
    %24 = arith.mulf %22, %23 : vector<16x160xbf16>
    %25 = vector.extract_strided_slice %6 {offsets = [0, 33], sizes = [16, 160], strides = [1, 1]} : vector<16x194xbf16> to vector<16x160xbf16>
    %26 = vector.extract_strided_slice %6 {offsets = [0, 34], sizes = [16, 160], strides = [1, 1]} : vector<16x194xbf16> to vector<16x160xbf16>
    %27 = vector.broadcast %1 : vector<1x160xbf16> to vector<16x160xbf16>
    %28 = arith.mulf %26, %27 : vector<16x160xbf16>
    %29 = tpu.concatenate %10, %11, %14, %17, %18, %21, %24, %25, %28 in 0 : vector<16x160xbf16>, vector<16x160xbf16>, vector<16x160xbf16>, vector<16x160xbf16>, vector<16x160xbf16>, vector<16x160xbf16>, vector<16x160xbf16>, vector<16x160xbf16>, vector<16x160xbf16> -> vector<144x160xbf16>
    %cst = arith.constant dense<0.000000e+00> : vector<16x160xf32>
    %30 = tpu.matmul %7, %29, %cst {dimension_numbers = #tpu.dot_dimension_numbers<[1], [0], [0], [1], [0, 0, 1, 1], [], []>} : vector<16x144xbf16>, vector<144x160xbf16>, vector<16x160xf32> -> vector<16x160xf32>
    %c0_6 = arith.constant 0 : index
    %c0_7 = arith.constant 0 : index
    %31 = vector.load %arg7[%c0_6, %c0_7] : memref<16x1xf32, #tpu.memory_space<vmem>>, vector<16x1xf32>
    %32 = vector.broadcast %31 : vector<16x1xf32> to vector<16x160xf32>
    %33 = arith.addf %30, %32 : vector<16x160xf32>
    %cst_8 = arith.constant 0.000000e+00 : f32
    %34 = vector.broadcast %cst_8 : f32 to vector<16x160xf32>
    %35 = arith.maximumf %33, %34 : vector<16x160xf32>
    %c0_9 = arith.constant 0 : index
    %c0_10 = arith.constant 0 : index
    %c0_11 = arith.constant 0 : index
    %36 = vector.load %arg5[%c0_9, %c0_10, %c0_11] : memref<1x1x160xbf16, #tpu.memory_space<vmem>>, vector<1x1x160xbf16>
    %37 = vector.shape_cast %36 : vector<1x1x160xbf16> to vector<1x160xbf16>
    %38 = arith.extf %37 : vector<1x160xbf16> to vector<1x160xf32>
    %39 = vector.broadcast %38 : vector<1x160xf32> to vector<16x160xf32>
    %40 = arith.mulf %35, %39 : vector<16x160xf32>
    %41 = arith.truncf %40 : vector<16x160xf32> to vector<16x160xbf16>
    %cst_12 = arith.constant 0.000000e+00 : bf16
    %42 = vector.broadcast %cst_12 : bf16 to vector<16x1xbf16>
    %43 = tpu.concatenate %42, %41, %42 in 1 : vector<16x1xbf16>, vector<16x160xbf16>, vector<16x1xbf16> -> vector<16x162xbf16>
    %c0_13 = arith.constant 0 : index
    %c0_14 = arith.constant 0 : index
    %44 = vector.load %arg8[%c0_13, %c0_14] : memref<4x144xbf16, #tpu.memory_space<vmem>>, vector<4x144xbf16>
    %45 = vector.extract_strided_slice %43 {offsets = [0, 0], sizes = [16, 128], strides = [1, 1]} : vector<16x162xbf16> to vector<16x128xbf16>
    %46 = vector.extract_strided_slice %0 {offsets = [0, 0], sizes = [1, 128], strides = [1, 1]} : vector<1x160xbf16> to vector<1x128xbf16>
    %47 = vector.broadcast %46 : vector<1x128xbf16> to vector<16x128xbf16>
    %48 = arith.mulf %45, %47 : vector<16x128xbf16>
    %49 = vector.extract_strided_slice %43 {offsets = [0, 1], sizes = [16, 128], strides = [1, 1]} : vector<16x162xbf16> to vector<16x128xbf16>
    %50 = vector.extract_strided_slice %43 {offsets = [0, 2], sizes = [16, 128], strides = [1, 1]} : vector<16x162xbf16> to vector<16x128xbf16>
    %51 = vector.extract_strided_slice %1 {offsets = [0, 0], sizes = [1, 128], strides = [1, 1]} : vector<1x160xbf16> to vector<1x128xbf16>
    %52 = vector.broadcast %51 : vector<1x128xbf16> to vector<16x128xbf16>
    %53 = arith.mulf %50, %52 : vector<16x128xbf16>
    %54 = vector.extract_strided_slice %43 {offsets = [0, 16], sizes = [16, 128], strides = [1, 1]} : vector<16x162xbf16> to vector<16x128xbf16>
    %55 = vector.extract_strided_slice %0 {offsets = [0, 0], sizes = [1, 128], strides = [1, 1]} : vector<1x160xbf16> to vector<1x128xbf16>
    %56 = vector.broadcast %55 : vector<1x128xbf16> to vector<16x128xbf16>
    %57 = arith.mulf %54, %56 : vector<16x128xbf16>
    %58 = vector.extract_strided_slice %43 {offsets = [0, 17], sizes = [16, 128], strides = [1, 1]} : vector<16x162xbf16> to vector<16x128xbf16>
    %59 = vector.extract_strided_slice %43 {offsets = [0, 18], sizes = [16, 128], strides = [1, 1]} : vector<16x162xbf16> to vector<16x128xbf16>
    %60 = vector.extract_strided_slice %1 {offsets = [0, 0], sizes = [1, 128], strides = [1, 1]} : vector<1x160xbf16> to vector<1x128xbf16>
    %61 = vector.broadcast %60 : vector<1x128xbf16> to vector<16x128xbf16>
    %62 = arith.mulf %59, %61 : vector<16x128xbf16>
    %63 = vector.extract_strided_slice %43 {offsets = [0, 32], sizes = [16, 128], strides = [1, 1]} : vector<16x162xbf16> to vector<16x128xbf16>
    %64 = vector.extract_strided_slice %0 {offsets = [0, 0], sizes = [1, 128], strides = [1, 1]} : vector<1x160xbf16> to vector<1x128xbf16>
    %65 = vector.broadcast %64 : vector<1x128xbf16> to vector<16x128xbf16>
    %66 = arith.mulf %63, %65 : vector<16x128xbf16>
    %67 = vector.extract_strided_slice %43 {offsets = [0, 33], sizes = [16, 128], strides = [1, 1]} : vector<16x162xbf16> to vector<16x128xbf16>
    %68 = vector.extract_strided_slice %43 {offsets = [0, 34], sizes = [16, 128], strides = [1, 1]} : vector<16x162xbf16> to vector<16x128xbf16>
    %69 = vector.extract_strided_slice %1 {offsets = [0, 0], sizes = [1, 128], strides = [1, 1]} : vector<1x160xbf16> to vector<1x128xbf16>
    %70 = vector.broadcast %69 : vector<1x128xbf16> to vector<16x128xbf16>
    %71 = arith.mulf %68, %70 : vector<16x128xbf16>
    %72 = tpu.concatenate %48, %49, %53, %57, %58, %62, %66, %67, %71 in 0 : vector<16x128xbf16>, vector<16x128xbf16>, vector<16x128xbf16>, vector<16x128xbf16>, vector<16x128xbf16>, vector<16x128xbf16>, vector<16x128xbf16>, vector<16x128xbf16>, vector<16x128xbf16> -> vector<144x128xbf16>
    %cst_15 = arith.constant dense<0.000000e+00> : vector<4x128xf32>
    %73 = tpu.matmul %44, %72, %cst_15 {dimension_numbers = #tpu.dot_dimension_numbers<[1], [0], [0], [1], [0, 0, 1, 1], [], []>} : vector<4x144xbf16>, vector<144x128xbf16>, vector<4x128xf32> -> vector<4x128xf32>
    %c0_16 = arith.constant 0 : index
    %c0_17 = arith.constant 0 : index
    %74 = vector.load %arg9[%c0_16, %c0_17] : memref<4x1xf32, #tpu.memory_space<vmem>>, vector<4x1xf32>
    %75 = vector.broadcast %74 : vector<4x1xf32> to vector<4x128xf32>
    %76 = arith.addf %73, %75 : vector<4x128xf32>
    %c0_18 = arith.constant 0 : index
    %c0_19 = arith.constant 0 : index
    %c0_20 = arith.constant 0 : index
    %77 = vector.load %arg3[%c0_18, %c0_19, %c0_20] : memref<1x4x128xbf16, #tpu.memory_space<vmem>>, vector<1x4x128xbf16>
    %78 = vector.shape_cast %77 : vector<1x4x128xbf16> to vector<4x128xbf16>
    %79 = arith.extf %78 : vector<4x128xbf16> to vector<4x128xf32>
    %80 = arith.addf %76, %79 : vector<4x128xf32>
    %cst_21 = arith.constant 0.000000e+00 : f32
    %81 = vector.broadcast %cst_21 : f32 to vector<4x128xf32>
    %82 = arith.maximumf %80, %81 : vector<4x128xf32>
    %c0_22 = arith.constant 0 : index
    %c0_23 = arith.constant 0 : index
    %c0_24 = arith.constant 0 : index
    %83 = vector.load %arg10[%c0_22, %c0_23, %c0_24] : memref<1x4x128xf32, #tpu.memory_space<vmem>>, vector<1x4x128xf32>
    %84 = vector.shape_cast %83 : vector<1x4x128xf32> to vector<4x128xf32>
    %85 = vector.shape_cast %82 : vector<4x128xf32> to vector<1x4x128xf32>
    tpu.vector_store %arg10[%c0_22, %c0_23, %c0_24], %85 {strides = array<i32>} : memref<1x4x128xf32, #tpu.memory_space<vmem>>, vector<1x4x128xf32>,
    return
  }
  func.func @transform_0(%arg0: i32, %arg1: i32) -> (i32, i32, i32) {
    %c0_i32 = arith.constant 0 : i32
    %c0_i32_0 = arith.constant 0 : i32
    %c0_i32_1 = arith.constant 0 : i32
    return %arg0, %c0_i32, %c0_i32_0 : i32, i32, i32
  }
  func.func @transform_1(%arg0: i32, %arg1: i32) -> (i32, i32, i32) {
    %c0_i32 = arith.constant 0 : i32
    %c0_i32_0 = arith.constant 0 : i32
    return %arg0, %c0_i32, %arg1 : i32, i32, i32
  }
  func.func @transform_2(%arg0: i32, %arg1: i32) -> (i32, i32) {
    %c0_i32 = arith.constant 0 : i32
    %c0_i32_0 = arith.constant 0 : i32
    %c0_i32_1 = arith.constant 0 : i32
    return %c0_i32, %c0_i32_0 : i32, i32
  }
  func.func @transform_3(%arg0: i32, %arg1: i32) -> (i32, i32, i32) {
    %c0_i32 = arith.constant 0 : i32
    %c0_i32_0 = arith.constant 0 : i32
    %c0_i32_1 = arith.constant 0 : i32
    return %arg1, %c0_i32, %c0_i32_0 : i32, i32, i32
  }
  func.func @transform_4(%arg0: i32, %arg1: i32) -> (i32, i32) {
    %c0_i32 = arith.constant 0 : i32
    %c0_i32_0 = arith.constant 0 : i32
    %c0_i32_1 = arith.constant 0 : i32
    return %c0_i32, %c0_i32_0 : i32, i32
  }
  func.func @transform_5(%arg0: i32, %arg1: i32) -> (i32, i32) {
    %c0_i32 = arith.constant 0 : i32
    %c0_i32_0 = arith.constant 0 : i32
    %c0_i32_1 = arith.constant 0 : i32
    return %c0_i32, %c0_i32_0 : i32, i32
  }
  func.func @transform_6(%arg0: i32, %arg1: i32) -> (i32, i32) {
    %c0_i32 = arith.constant 0 : i32
    %c0_i32_0 = arith.constant 0 : i32
    %c0_i32_1 = arith.constant 0 : i32
    return %c0_i32, %c0_i32_0 : i32, i32
  }
  func.func @transform_7(%arg0: i32, %arg1: i32) -> (i32, i32) {
    %c0_i32 = arith.constant 0 : i32
    %c0_i32_0 = arith.constant 0 : i32
    %c0_i32_1 = arith.constant 0 : i32
    return %c0_i32, %c0_i32_0 : i32, i32
  }
  func.func @transform_8(%arg0: i32, %arg1: i32) -> (i32, i32, i32) {
    %c0_i32 = arith.constant 0 : i32
    %c0_i32_0 = arith.constant 0 : i32
    return %arg0, %c0_i32, %arg1 : i32, i32, i32
  }
}

</mosaic_0001>

<bundles_post_ra>
// kernel: tpu_custom_call.1
= control target key start
LH: loop header
LB: loop body
LE: loop exit
PB: predicated region body
PF: predicated region fallthrough
CT: control target
= control target key end

     0   :  { %s1808_s0 = inlined_call_operand.hbm [shape: bf16[2,16,322], index: 0, kind: input, shape index: {}]   ;;  %s1809_s1 = inlined_call_operand.vmem [shape: bf16[2,4,256], index: 1, kind: input, shape index: {}]   ;;  %s1810_s2 = inlined_call_operand.vmem [shape: bf16[2,160], index: 2, kind: input, shape index: {}]   ;;  %s1811_s3 = inlined_call_operand.vmem [shape: bf16[2,1,160], index: 3, kind: input, shape index: {}]   ;;  %s1812_s4 = inlined_call_operand.vmem [shape: bf16[16,144], index: 4, kind: input, shape index: {}]   ;;  %s1813_s5 = inlined_call_operand.vmem [shape: f32[16,1], index: 5, kind: input, shape index: {}]   ;;  %s1814_s6 = inlined_call_operand.vmem [shape: bf16[4,144], index: 6, kind: input, shape index: {}]   ;;  %s1815_s7 = inlined_call_operand.vmem [shape: f32[4,1], index: 7, kind: input, shape index: {}]   ;;  %s1816_s8 = inlined_call_operand.hbm [shape: f32[2,4,256], index: 8, kind: output, shape index: {}]  }
   0x1   :  { %1834 = sst [smem:[#allocation14_spill]] %s1816_s8 }
   0x2   :  { %13 = vsyncpa [#allocation3], 0 }
   0x3   :  { %15 = vsyncpa [#allocation3 + $0x1], 0 }
   0x4   :  { %16 = vsyncpa [#allocation4], 0 }
   0x5   :  { %18 = vsyncpa [#allocation4 + $0x1], 0  ;;  %s1424_s27 = smov 0   ;;  %s1426_s28 = smov 0  }
   0x6   :  { %s1428_s29 = smov 0   ;;  %s1430_s30 = smov 0  }
   0x7   :  { %s1432_s9 = smov 0   ;;  %s1434_s10 = smov 0  }
   0x8   :  { %s1436_s11 = smov 0   ;;  %s1438_s12 = smov 0  }
   0x9   :  { %s1440_s13 = smov 0   ;;  %s1442_s14 = smov 0  }
   0xa   :  { %s1444_s15 = smov 0  }
   0xb LB: > { %1835 = sst [smem:[#allocation8_spill]] %s1337_s10  ;;  %s1037_s16 = sadd.s32 4294967295, %s1357_s15   ;;  %s1357_s15 = sphi %s1444_s15, %s24_s15   ;;  %s1353_s14 = sphi %s1442_s14, %s1861_s14   ;;  %s1349_s13 = sphi %s1440_s13, %s1867_s13   ;;  %s1345_s12 = sphi %s1438_s12, %s1859_s12   ;;  %s1341_s11 = sphi %s1436_s11, %s1858_s11   ;;  %s1337_s10 = sphi %s1434_s10, %s1857_s10   ;;  %s1333_s9 = sphi %s1432_s9, %s1866_s9   ;;  %s1329_s30 = sphi %s1430_s30, %s1865_s30   ;;  %s1325_s29 = sphi %s1428_s29, %s1864_s29   ;;  %s1321_s28 = sphi %s1426_s28, %s1863_s28   ;;  %s1317_s27 = sphi %s1424_s27, %s1862_s27  }
   0xc   : > { %1836 = sst [smem:[#allocation9_spill]] %s1349_s13  ;;  %s1038_s17 = sadd.s32 4294967294, %s1357_s15  }
   0xd   : > { %1837 = sst [smem:[#allocation10_spill]] %s1353_s14  ;;  %s33_s18 = sadd.s32 1, %s1349_s13 }
   0xe   : > { %s36_s19 = sadd.s32 1, %s1353_s14  ;;  %p34_p0 = scmp.ge.s32.totalorder %s33_s18, 2 }
   0xf   : > { %s43_s20 = sadd.s32 1, %s1337_s10  ;;  %p50_p1 = scmp.ne.s32.totalorder %s1337_s10, %s1333_s9 }
  0x10   : > { %p51_p2 = scmp.eq.s32.totalorder %s1357_s15, 0  ;;  %s1869_s18 = smov (%p34_p0, %s33_s18), 0 }
  0x11   : > { %1838 = sst [smem:[#allocation11_spill]] %s1869_s18  ;;  %s1871_s19 = smov (!%p34_p0, %s36_s19), %s1353_s14 }
  0x12   : > { %p1488_p3 = por %p51_p2, %p50_p1  ;;  %p56_p4 = scmp.ne.s32.totalorder %s1333_s9, %s1329_s30 }
  0x13   : > { %p38_p5 = scmp.ge.s32.totalorder %s1871_s19, 2  ;;  %p57_p6 = scmp.eq.s32.totalorder %s1037_s16, 0 }
  0x14   : > { %s226_s22 = ssub.s32 %s1349_s13, %s1869_s18  ;;  %s230_s23 = sadd.s32 1, %s1325_s29 }
  0x15   : > { %s1873_s19 = smov (%p38_p5, %s1871_s19), 0  ;;  %p1498_p7 = por %p57_p6, %p56_p4 }
  0x16   : > { %1840 = sst [smem:[#allocation12_spill]] %s1873_s19  ;;  %p240_p8 = scmp.ne.s32.totalorder %s1325_s29, %s1321_s28 }
  0x17   : > { %s40_s25 = ssub.s32 %s1353_s14, %s1873_s19  ;;  %p241_p9 = scmp.eq.s32.totalorder %s1037_s16, 3 }
  0x18   : > { %p41_p10 = scmp.eq.s32.totalorder %s40_s25, 0  ;;  %s227_s26 = sor.u32 %s226_s22, %s40_s25 }
  0x19   : > { %p228_p11 = scmp.eq.s32.totalorder %s227_s26, 0  ;;  %p1506_p12 = por %p241_p9, %p240_p8 }
  0x1a   : > { %s1511_s18 = scalar_select %p41_p10, %s1337_s10, %s43_s20  }
  0x1b   : > { %s1842_s30 = scalar_select %p1506_p12, 1, 0 }
  0x1c   : > { %1843 = sst [smem:[#allocation13_spill]] %s1511_s18  ;;  %p246_p13 = scmp.ne.s32.totalorder %s1321_s28, %s1317_s27 }
  0x1d   : > { %s1514_s13 = scalar_select %p228_p11, %s1325_s29, %s230_s23  }
  0x1e   : > { %p247_p0 = scmp.eq.s32.totalorder %s1038_s17, 3  ;;  %p1090_p1 = scmp.lt.s32.totalorder %s1357_s15, 4 }
  0x1f   : > { %s282_s16 = sand.u32 1, %s1337_s10   ;;  %s1076_s22 = smul.u32 384, %s1353_s14 }
  0x20   : > { %p1519_p2 = por %p247_p0, %p246_p13  ;;  %s1075_s19 = smul.u32 24, %s282_s16 }
  0x21   : > { %p1527_p4 = pnand %p1090_p1, %p1488_p3  ;;  %s1534_s23 = scalar_lea.hbm %s1808_s0, %s1076_s22 }
  0x22   : > { %s1844_s8 = scalar_select %p1519_p2, 1, 0 }
  0x23   : > { %s286_s17 = scalar_lea.vmem [#allocation2], %s1075_s19  ;;  %s1539_s21 = scalar_lea.sflag [#allocation3], %s282_s16 }
  0x24   : > { %s293_s18 = sshll.u32 %s286_s17, 4  ;;  %s1205_s14 = scalar_lea.hbm %s1534_s23, 384  ;;  %s1536_s18 = int_to_ptr.vmem [resolvable:$true] %s293_s18 }
  0x25   : > { %p1206_p3 = scmp.ne.s32.totalorder %s1534_s23, %s1205_s14  ;;  %p1207_p6 = pneg %p1527_p4 }
  0x26   : > { %s1210_s20 = scalar_lea.hbm %s1808_s0, 768  ;;  %p1211_p10 = scmp.lt.u32.totalorder %s1534_s23, %s1808_s0 }
  0x27   : > { %p1208_p8 = pnand %p1207_p6, %p1206_p3  ;;  %p1212_p11 = scmp.lt.u32.totalorder %s1210_s20, %s1205_s14 }
  0x28   : > { %p1214_p0 = scmp.lt.u32.totalorder %s1205_s14, %s1534_s23 }
  0x29   : > { %p1209_p9 = pneg %p1208_p8  ;;  %p1213_p13 = por %p1212_p11, %p1211_p10 }
  0x2b   : > { %p1215_p1 = por %p1214_p0, %p1213_p13 }
  0x2d   : > { %p1216_p5 = pnand %p1215_p1, %p1209_p9 }
  0x2f   : > { %1219 = shalt.err (!%p1216_p5)
}
  0x30   : > { %s1220_s16 = scalar_lea.vmem %s1536_s18, 384  ;;  %s1359_s17 = smov [#allocation2]  }
  0x31   : > { %p1221_p3 = scmp.ne.s32.totalorder %s1536_s18, %s1220_s16  ;;  %s1225_s22 = sshll.u32 %s1359_s17, 4  ;;  %s1226_s22 = int_to_ptr.vmem [resolvable:$false] %s1225_s22 }
  0x32   : > { %s1227_s10 = scalar_lea.vmem %s1226_s22, 768  ;;  %p1228_p12 = scmp.lt.s32.totalorder %s1536_s18, %s1226_s22 }
  0x33   : > { %p1223_p8 = pnand %p1221_p3, %p1207_p6  ;;  %p1229_p10 = scmp.lt.s32.totalorder %s1227_s10, %s1220_s16 }
  0x35   : > { %p1224_p2 = pneg %p1223_p8  ;;  %p1230_p11 = por %p1229_p10, %p1228_p12 }
  0x37   : > { %p1231_p13 = pnand %p1230_p11, %p1224_p2 }
  0x39   : > { %1234 = shalt.err (!%p1231_p13)
}
  0x3a   : > { %s1360_s14 = smov 192   ;;  %s1361_s26 = smov 12  }
  0x3b   : > { %1085 = dma.hbm_to_vmem [thread:$0]  (!%p1527_p4), %s1534_s23, 384, %s1536_s18, %s1539_s21, %s1360_s14, %s1360_s14, %s1361_s26  }
  0x3c   : > { %p319_p5 = scmp.lt.s32.totalorder %s1357_s15, 5  ;;  %p1846_p6 = scmp.ge.s32.totalorder %s1357_s15, 1 }
  0x3e   : > { %p320_p9 = pnand %p1846_p6, %p319_p5 }
  0x3f   : > { %s325_s20 = sand.u32 (!%p320_p9), 1, %s1333_s9  }
  0x40   : > { %323 = sbr.rel (%p320_p9) target bundleno = 1080 (0x438), region = 52  ;;  %s326_s16 = scalar_lea.sflag (!%p320_p9), [#allocation3], %s325_s20 }
  0x41   : > { %s1571_s19 = smul.u32 (!%p320_p9), 24, %s325_s20 }
  0x43   : > { %s329_s17 = scalar_lea.vmem (!%p320_p9), [#allocation2], %s1571_s19 }
  0x47   : > { %1308 = dma.done.wait (%p1498_p7), %s326_s16, 384  }
  0x48   : > { %1310 = vsyncadd (%p1498_p7), %s326_s16, 4294966912  ;;  %v401_v0 = vlaneseq  ;;  %v1362_v1 = vmov 1966171168   ;;  %v1584_v6 = vld [vmem:[%s1810_s2] sm:$0x3]  ;;  %s1047_s24 = sshll.u32 %s1341_s11, 7 }
  0x49   : > { %v399_v2 = vunpack.c.l.s4 %v1362_v1  ;;  %s389_s23 = sshra.s32 %s1047_s24, 7  ;;  %s1363_s10 = smov 2   ;;  %vm464_vm0 = vcmask 15360   ;;  %vm472_vm1 = vcmask 130048   ;;  %vm480_vm2 = vcmask 146432  }
  0x4a   : > { %v1578_v3 = vshrl.u32 %v401_v0, 7  ;;  %s1048_s21 = sshll.u32 %s389_s23, 2  ;;  %s1364_s14 = smov 18   ;;  %vm523_vm3 = vcmask 1039360   ;;  %vm488_vm4 = vcmask 261120   ;;  %vm496_vm5 = vcmask 277504  }
  0x4b   : > { %v400_v4 = vunpack.c.0.s8 %v399_v2  ;;  %s392_s22 = scalar_lea.vmem %s329_s17, %s1048_s21 [#allocation2]  ;;  %s1365_s26 = smov 16   ;;  %v1204_v63 = vld [vmem:[%s1812_s4 + $0x4] ss:$8 sps:$4 sm:$0xff]   ;;  %vm539_vm6 = vcmask 1031168   ;;  %vm555_vm7 = vcmask 916480   ;;  %vm563_vm8 = vcmask 908288  }
  0x4c   : > { %v1589_v11 = vsub.s32 0, %v1578_v3  ;;  %v1599_v24 = vld [vmem:[%s392_s22] sm:$0xff]  ;;  %v1601_v25 = vld [vmem:[%s392_s22 + $0xc] sm:$0xff]  ;;  %s1366_s20 = smov 32   ;;  %s1367_s19 = smov 34   ;;  %1067 = vmatprep.mubr.msk.bf16.mxu0 %vm472_vm1, %v1204_v63  ;;  %vm579_vm9 = vcmask 900096  }
  0x4d   : > { %v403_v5 = vsub.s32 %v400_v4, %v1578_v3  ;;  %v1607_v26 = vcombine.low %v1599_v24, %v1601_v25  ;;  %s1368_s16 = smov 127   ;;  %v1614_v27 = vcombine.high %v1599_v24, %v1601_v25  ;;  %s1369_s17 = smov 126   ;;  %v1374_v4 = vmov 0  }
  0x4e   : > { %s1830_s18 = smov 112   ;;  %s1828_s25 = smov 111   ;;  %1198 = vset.pattern.permute.xlu1 %v1374_v4  ;;  %1199 = vset.pattern.permute.xlu0 %v1374_v4  ;;  %vm595_vm10 = vcmask 785408   ;;  %vm603_vm11 = vcmask 777216   ;;  %vm619_vm12 = vcmask 769024   ;;  %vm728_vm13 = vcmask 7168  }
  0x4f   : > { %v404_v7 = vrot.slane %v1584_v6, %v403_v5  ;;  %s1826_s24 = smov 110   ;;  %s1824_s22 = smov 96   ;;  %861 = vmatprep.subr.bf16.mxu1 %v1374_v4  ;;  %vm735_vm14 = vcmask 269312  }
  0x50   : > { %s1375_s23 = smov 95   ;;  %s1832_s21 = smov 94  }
  0x51   : > { %v405_v8 = vcombine.high %v404_v7, %v404_v7  ;;  %v412_v9 = vrot.slane %v404_v7, %v403_v5  ;;  %p376_p7 = scmp.lt.s32.totalorder %s1341_s11, 1  ;;  %p374_p12 = scmp.lt.s32.totalorder %s1345_s12, 1 }
  0x52   : > { %p1854_p4 = scmp.ne.s32.totalorder %s1842_s30, 0 }
  0x53   : > { %v419_v10 = vrot.slane %v405_v8, %v403_v5  ;;  %v442_v12 = vshrl.u32 %v412_v9, 16  ;;  %v421_v15 = vpack.i.b16 %v412_v9, %v412_v9 }
  0x55   : > { %v443_v13 = vpack.i.b16 %v442_v12, %v442_v12  ;;  %v449_v14 = vshrl.u32 %v419_v10, 16  ;;  %v428_v16 = vpack.i.b16 %v419_v10, %v419_v10  ;;  %v426_v20 = vrot.slane %v421_v15, %v1589_v11  ;;  %v623_v10 = vld [vmem:[%s1813_s5] sm:$0xff]  ;;  %v624_v12 = vld [vmem:[%s1813_s5 + $0x8] sm:$0xff] }
  0x57   : > { %v448_v17 = vrot.slane %v443_v13, %v1589_v11  ;;  %v450_v18 = vpack.i.b16 %v449_v14, %v449_v14  ;;  %v433_v21 = vrot.slane %v428_v16, %v1589_v11 }
  0x59   : > { %v455_v19 = vrot.slane %v450_v18, %v1589_v11  ;;  %v1049_v23 = vcombine.low %v426_v20, %v433_v21 }
  0x5b   : > { %v1050_v22 = vcombine.low %v448_v17, %v455_v19  ;;  %v440_v28 = vmul.bf16 %v1049_v23, %v1599_v24  ;;  %v441_v29 = vmul.bf16 %v1049_v23, %v1601_v25 }
  0x5d   : > { %461 = vrot.lane.b32.xlu0 %v1050_v22, %s1363_s10  ;;  %477 = vrot.lane.b32.xlu1 %v1050_v22, %s1364_s14  ;;  %v1052_v30 = vcombine.high %v440_v28, %v441_v29  ;;  %v1051_v31 = vcombine.low %v440_v28, %v441_v29 }
  0x5f   : > { %648 = vmatprep.subr.bf16.mxu0 %v1052_v30 }
  0x60   : > { %649 = vmatpush1.bf16.msra.mxu0 %v1051_v31 }
  0x61   : > { %469 = vrot.lane.b32.xlu0 %v1049_v23, %s1365_s26  ;;  %485 = vrot.lane.b32.xlu1 %v1049_v23, %s1366_s20 }
  0x65   : > { %493 = vrot.lane.b32.xlu0 %v1050_v22, %s1367_s19  ;;  %519 = vrot.lane.b32.xlu1 %v1607_v26, %s1368_s16 }
  0x69   : > { %521 = vrot.lane.b32.xlu0 %v1614_v27, %s1368_s16 }
  0xcf   : > { %v462_v32 = vpop.permute.xlu0 %461  ;;  %v478_v33 = vpop.permute.xlu1 %477 }
  0xd0   : > { %v463_v34 = vrot.slane %v462_v32, 4  ;;  %v479_v44 = vrot.slane %v478_v33, 4 }
  0xd2   : > { %v465_v35 = vsel %vm464_vm0, %v463_v34, %v462_v32  ;;  %v481_v51 = vsel %vm480_vm2, %v479_v44, %v478_v33  ;;  %v1202_v34 = vld [vmem:[%s1812_s4] ss:$8 sps:$4 sm:$0xff]  }
  0xd3   : > { %v467_v36 = vmul.bf16 %v465_v35, %v1599_v24  ;;  %v468_v37 = vmul.bf16 %v465_v35, %v1601_v25  ;;  %v470_v38 = vpop.permute.xlu0 %469  ;;  %v486_v42 = vpop.permute.xlu1 %485  ;;  %v483_v55 = vmul.bf16 %v481_v51, %v1599_v24  ;;  %v484_v56 = vmul.bf16 %v481_v51, %v1601_v25 }
  0xd4   : > { %v471_v39 = vrot.slane %v470_v38, 4  ;;  %v487_v52 = vrot.slane %v486_v42, 4  ;;  %v748_v35 = vshrl.u32 %v1584_v6, 16 }
  0xd5   : > { %v1055_v40 = vcombine.low %v467_v36, %v468_v37  ;;  %v1056_v41 = vcombine.high %v467_v36, %v468_v37  ;;  %v1060_v60 = vcombine.high %v483_v55, %v484_v56  ;;  %v1059_v61 = vcombine.low %v483_v55, %v484_v56 }
  0xd6   : > { %v473_v43 = vsel %vm472_vm1, %v471_v39, %v470_v38  ;;  %v489_v57 = vsel %vm488_vm4, %v487_v52, %v486_v42  ;;  %v749_v36 = vpack.i.b16 %v748_v35, %v748_v35 }
  0xd7   : > { %v475_v45 = vmul.bf16 %v473_v43, %v1599_v24  ;;  %v476_v46 = vmul.bf16 %v473_v43, %v1601_v25  ;;  %535 = vrot.lane.b32.xlu1 %v1055_v40, %s1369_s17  ;;  %537 = vrot.lane.b32.xlu0 %v1056_v41, %s1369_s17  ;;  %v494_v47 = vpop.permute.xlu0 %493  ;;  %v520_v50 = vpop.permute.xlu1 %519  ;;  %v491_v58 = vmul.bf16 %v489_v57, %v1599_v24  ;;  %v704_v40 = vsub.s32 2, %v1578_v3 }
  0xd8   : > { %v492_v59 = vmul.bf16 %v489_v57, %v1601_v25  ;;  %v495_v62 = vrot.slane %v494_v47, 4  ;;  %v754_v37 = vrot.slane %v749_v36, %v1589_v11 }
  0xd9   : > { %v1058_v48 = vcombine.high %v475_v45, %v476_v46  ;;  %v1057_v49 = vcombine.low %v475_v45, %v476_v46 }
  0xda   : > { %v1062_v0 = vcombine.high %v491_v58, %v492_v59  ;;  %v1061_v1 = vcombine.low %v491_v58, %v492_v59  ;;  %v497_v2 = vsel %vm496_vm5, %v495_v62, %v494_v47 }
  0xdb   : > { %553 = vrot.lane.b32.xlu0 %v1058_v48, %s1830_s18  ;;  %551 = vrot.lane.b32.xlu1 %v1057_v49, %s1830_s18  ;;  %v522_v53 = vpop.permute.xlu0 %521  ;;  %v499_v5 = vmul.bf16 %v497_v2, %v1599_v24  ;;  %v500_v7 = vmul.bf16 %v497_v2, %v1601_v25 }
  0xdc   : > { %650 = vmatprep.subr.bf16.mxu0 %v522_v53  ;;  %v524_v54 = vsel %vm523_vm3, %v520_v50, %v522_v53 }
  0xdd   : > { %651 = vmatpush1.bf16.msra.mxu0 %v524_v54  ;;  %v1064_v8 = vcombine.high %v499_v5, %v500_v7  ;;  %v1063_v9 = vcombine.low %v499_v5, %v500_v7 }
  0xdf   : > { %561 = vrot.lane.b32.xlu0 %v1614_v27, %s1828_s25  ;;  %559 = vrot.lane.b32.xlu1 %v1607_v26, %s1828_s25 }
  0xe3   : > { %577 = vrot.lane.b32.xlu0 %v1060_v60, %s1826_s24  ;;  %575 = vrot.lane.b32.xlu1 %v1059_v61, %s1826_s24  ;;  %s1680_s24 = scalar_select %p376_p7, %s1341_s11, 1 }
  0xe7   : > { %593 = vrot.lane.b32.xlu0 %v1062_v0, %s1824_s22  ;;  %591 = vrot.lane.b32.xlu1 %v1061_v1, %s1824_s22  ;;  %s1046_s22 = sshll.u32 %s1680_s24, 1  ;;  %v741_v0 = vpack.i.b16 %v1584_v6, %v1584_v6 }
  0xe9   : > { %v746_v1 = vrot.slane %v741_v0, %v1589_v11 }
  0xeb   : > { %601 = vrot.lane.b32.xlu0 %v1614_v27, %s1375_s23  ;;  %599 = vrot.lane.b32.xlu1 %v1607_v26, %s1375_s23 }
  0xef   : > { %617 = vrot.lane.b32.xlu0 %v1064_v8, %s1832_s21  ;;  %615 = vrot.lane.b32.xlu1 %v1063_v9, %s1832_s21  ;;  %s385_s21 = scalar_lea.vmem %s1811_s3, %s1046_s22 }
  0xf0   : > { %v695_v38 = vld [vmem:[%s385_s21] sm:$0x3]  ;;  %s1851_s21 = smov 94  }
  0xf1   : > { %v696_v39 = vunpack.c.l.bf16 %v695_v38 }
  0xf3   : > { %627 = vperm.xlu1 %1198, %v623_v10   ;;  %632 = vperm.xlu0 %1199, %v624_v12   ;;  %v701_v42 = vrot.slane %v696_v39, %v1589_v11  ;;  %v705_v44 = vrot.slane %v696_v39, %v704_v40 }
  0xf5   : > { %v711_v51 = vrot.slane %v701_v42, %v1589_v11  ;;  %v715_v55 = vrot.slane %v705_v44, %v1589_v11 }
  0xf7   : > { %756 = vrot.lane.b32.xlu0 %v754_v37, %s1363_s10  ;;  %s1377_s10 = smov 1  }
  0xfb   : > { %767 = vrot.lane.b32.xlu0 %v754_v37, %s1364_s14  ;;  %s1847_s14 = smov 112  }
  0xff   : > { %777 = vrot.lane.b32.xlu0 %v754_v37, %s1367_s19 }
 0x149   : > { %v536_v13 = vpop.permute.xlu1 %535  ;;  %v538_v14 = vpop.permute.xlu0 %537 }
 0x14a   : > { %652 = vmatprep.subr.bf16.mxu0 %v538_v14  ;;  %v540_v15 = vsel %vm539_vm6, %v536_v13, %v538_v14 }
 0x14b   : > { %653 = vmatpush1.bf16.msra.mxu0 %v540_v15 }
 0x14d   : > { %v552_v16 = vpop.permute.xlu1 %551  ;;  %v554_v17 = vpop.permute.xlu0 %553 }
 0x14e   : > { %654 = vmatprep.subr.bf16.mxu0 %v554_v17  ;;  %v556_v18 = vsel %vm555_vm7, %v552_v16, %v554_v17 }
 0x14f   : > { %655 = vmatpush1.bf16.msra.mxu0 %v556_v18 }
 0x151   : > { %v560_v19 = vpop.permute.xlu1 %559  ;;  %v562_v20 = vpop.permute.xlu0 %561 }
 0x152   : > { %656 = vmatprep.subr.bf16.mxu0 %v562_v20  ;;  %v564_v21 = vsel %vm563_vm8, %v560_v19, %v562_v20 }
 0x153   : > { %657 = vmatpush1.bf16.msra.mxu0 %v564_v21  ;;  %v1068_v21 = vld.sshfl [vmem:[%s1814_s6] sm:$0x33 pattern:$0x76325410] }
 0x155   : > { %v576_v22 = vpop.permute.xlu1 %575  ;;  %v578_v23 = vpop.permute.xlu0 %577 }
 0x156   : > { %658 = vmatprep.subr.bf16.mxu0 %v578_v23  ;;  %v580_v24 = vsel %vm579_vm9, %v576_v22, %v578_v23  ;;  %v856_v22 = vcombine.high %v1068_v21, %v1068_v21 }
 0x157   : > { %659 = vmatpush1.bf16.msra.mxu0 %v580_v24 }
 0x158   : > { %1069 = vmatprep.mubr.msk.bf16.mxu1 %vm472_vm1, %v856_v22 }
 0x159   : > { %v592_v25 = vpop.permute.xlu1 %591  ;;  %v594_v26 = vpop.permute.xlu0 %593 }
 0x15a   : > { %660 = vmatprep.subr.bf16.mxu0 %v594_v26  ;;  %v596_v27 = vsel %vm595_vm10, %v592_v25, %v594_v26  ;;  %v842_v26 = vld [vmem:[%s1815_s7] sm:$0xf] }
 0x15b   : > { %661 = vmatpush1.bf16.msra.mxu0 %v596_v27 }
 0x15d   : > { %v600_v28 = vpop.permute.xlu1 %599  ;;  %v602_v29 = vpop.permute.xlu0 %601 }
 0x15e   : > { %662 = vmatprep.subr.bf16.mxu0 %v602_v29  ;;  %v604_v30 = vsel %vm603_vm11, %v600_v28, %v602_v29 }
 0x15f   : > { %663 = vmatpush1.bf16.msra.mxu0 %v604_v30 }
 0x161   : > { %v616_v31 = vpop.permute.xlu1 %615  ;;  %v618_v32 = vpop.permute.xlu0 %617 }
 0x162   : > { %664 = vmatprep.subr.bf16.mxu0 %v618_v32  ;;  %v620_v33 = vsel %vm619_vm12, %v616_v31, %v618_v32 }
 0x163   : > { %665 = vmatpush1.bf16.msra.mxu0 %v620_v33 }
 0x166   : > { %681 = vmatmul.mubr.bf16.vlgmr.msra.gmra.mrb[0].mxu0 %v1202_v34 }
 0x172   : > { %v628_v41 = vpop.permute.xlu1 %627  ;;  %v633_v45 = vpop.permute.xlu0 %632 }
 0x176   : > { %v757_v8 = vpop.permute.xlu0 %756 }
 0x17a   : > { %v768_v16 = vpop.permute.xlu0 %767 }
 0x17e   : > { %v778_v24 = vpop.permute.xlu0 %777 }
 0x239   : > { %v682_v43 = vpop.f32.mrb[0].mxu0 }
 0x23a   : > { %v683_v46 = vadd.f32 %v682_v43, %v628_v41  ;;  %v684_v47 = vpop.f32.mrb[1].mxu0 }
 0x23b   : > { %v685_v48 = vadd.f32 %v684_v47, %v628_v41  ;;  %v686_v49 = vpop.f32.mrb[2].mxu0 }
 0x23c   : > { %v691_v50 = vmax.f32 %v683_v46, 0.0  ;;  %v687_v52 = vadd.f32 %v686_v49, %v633_v45  ;;  %v688_v53 = vpop.f32.mrb[3].mxu0 }
 0x23d   : > { %v692_v54 = vmax.f32 %v685_v48, 0.0  ;;  %v689_v56 = vadd.f32 %v688_v53, %v633_v45 }
 0x23e   : > { %v693_v3 = vmax.f32 %v687_v52, 0.0  ;;  %v716_v58 = vmul.f32 %v711_v51, %v691_v50 }
 0x23f   : > { %v694_v57 = vmax.f32 %v689_v56, 0.0  ;;  %v717_v60 = vmul.f32 %v715_v55, %v692_v54 }
 0x240   : > { %v718_v59 = vmul.f32 %v711_v51, %v693_v3 }
 0x241   : > { %v719_v61 = vmul.f32 %v715_v55, %v694_v57 }
 0x242   : > { %v720_v62 = vpack.c.bf16 %v718_v59, %v716_v58 }
 0x243   : > { %v721_v63 = vpack.c.bf16 %v719_v61, %v717_v60 }
 0x244   : > { %724 = vrot.lane.b32.xlu1 %v720_v62, %s1377_s10 }
 0x248   : > { %726 = vrot.lane.b32.xlu1 %v721_v63, %s1377_s10 }
 0x24c   : > { %762 = vrot.lane.b32.xlu1 %v746_v1, %s1365_s26  ;;  %s1848_s26 = smov 111  }
 0x250   : > { %772 = vrot.lane.b32.xlu1 %v746_v1, %s1366_s20  ;;  %s1849_s20 = smov 110  }
 0x2b6   : > { %v725_v2 = vpop.permute.xlu1 %724 }
 0x2b7   : > { %v733_v5 = vsel %vm728_vm13, 0, %v725_v2 }
 0x2b8   : > { %784 = vrot.lane.b32.xlu1 %v733_v5, %s1368_s16  ;;  %v747_v7 = vmul.bf16 %v746_v1, %v733_v5  ;;  %v759_v10 = vmul.bf16 %v757_v8, %v733_v5  ;;  %v770_v17 = vmul.bf16 %v768_v16, %v733_v5  ;;  %v780_v25 = vmul.bf16 %v778_v24, %v733_v5 }
 0x2ba   : > { %862 = vmatpush1.bf16.msra.mxu1 %v747_v7  ;;  %v727_v9 = vpop.permute.xlu1 %726 }
 0x2bb   : > { %v729_v12 = vsel %vm728_vm13, %v725_v2, %v727_v9  ;;  %863 = vmatprep.subr.bf16.mxu1 %v1374_v4 }
 0x2bc   : > { %v737_v6 = vsel %vm735_vm14, %v729_v12, 0  ;;  %792 = vrot.lane.b32.xlu1 %v759_v10, %s1369_s17 }
 0x2bd   : > { %786 = vrot.lane.b32.xlu0 %v737_v6, %s1368_s16  ;;  %v760_v14 = vmul.bf16 %v757_v8, %v737_v6  ;;  %v771_v20 = vmul.bf16 %v768_v16, %v737_v6  ;;  %v781_v27 = vmul.bf16 %v778_v24, %v737_v6  ;;  %s371_s16 = sand.u32 1, %s1321_s28  }
 0x2be   : > { %v763_v11 = vpop.permute.xlu1 %762 }
 0x2bf   : > { %v765_v13 = vmul.bf16 %v763_v11, %v733_v5  ;;  %v766_v15 = vmul.bf16 %v763_v11, %v737_v6 }
 0x2c1   : > { %794 = vrot.lane.b32.xlu0 %v760_v14, %s1369_s17  ;;  %800 = vrot.lane.b32.xlu1 %v765_v13, %s1847_s14  ;;  %s1850_s17 = smov 96  }
 0x2c2   : > { %v773_v18 = vpop.permute.xlu1 %772 }
 0x2c3   : > { %v775_v19 = vmul.bf16 %v773_v18, %v733_v5  ;;  %v776_v23 = vmul.bf16 %v773_v18, %v737_v6 }
 0x2c5   : > { %802 = vrot.lane.b32.xlu0 %v766_v15, %s1847_s14  ;;  %806 = vrot.lane.b32.xlu1 %v733_v5, %s1848_s26 }
 0x2c9   : > { %808 = vrot.lane.b32.xlu0 %v737_v6, %s1848_s26  ;;  %814 = vrot.lane.b32.xlu1 %v770_v17, %s1849_s20 }
 0x2cd   : > { %816 = vrot.lane.b32.xlu0 %v771_v20, %s1849_s20  ;;  %822 = vrot.lane.b32.xlu1 %v775_v19, %s1850_s17 }
 0x2d1   : > { %824 = vrot.lane.b32.xlu0 %v776_v23, %s1850_s17  ;;  %828 = vrot.lane.b32.xlu1 %v733_v5, %s1375_s23  ;;  %s1043_s17 = sshll.u32 %s371_s16, 2 }
 0x2d5   : > { %830 = vrot.lane.b32.xlu0 %v737_v6, %s1375_s23  ;;  %836 = vrot.lane.b32.xlu1 %v780_v25, %s1851_s21  ;;  %s375_s23 = scalar_select %p374_p12, %s1345_s12, 1 }
 0x2d7   : > { %s1044_s25 = sshll.u32 %s375_s23, 1  ;;  %s373_s23 = scalar_lea.vmem [#allocation5], %s1043_s17 }
 0x2d8   : > { %s379_s10 = sadd.s32 %s1044_s25, %s1680_s24  ;;  %s922_s24 = sshll.u32 %s373_s23, 4  ;;  %s1748_s24 = int_to_ptr.vmem [resolvable:$true] %s922_s24 }
 0x2d9   : > { %838 = vrot.lane.b32.xlu0 %v781_v27, %s1851_s21  ;;  %845 = vperm.xlu1 %1198, %v842_v26   ;;  %s1045_s14 = sshll.u32 %s379_s10, 1  ;;  %s1071_s21 = sshll.u32 %s1345_s12, 1 }
 0x2da   : > { %s381_s19 = scalar_lea.vmem %s1809_s1, %s1045_s14  ;;  %s918_s22 = sadd.s32 %s1341_s11, %s1071_s21 }
 0x2db   : > { %v901_v52 = vld [vmem:[%s381_s19] sm:$0x3]  ;;  %s1072_s18 = sshll.u32 %s918_s22, 6  ;;  %s1852_s14 = sld [smem:[#allocation14_spill]] }
 0x2dc   : > { %s907_s11 = scalar_lea.sflag [#allocation4], %s371_s16  ;;  %s1235_s12 = scalar_lea.vmem %s1748_s24, 64 }
 0x2dd   : > { %p1236_p2 = scmp.ne.s32.totalorder %s1748_s24, %s1235_s12  ;;  %s1378_s19 = smov [#allocation5]  }
 0x2de   : > { %s1239_s17 = sshll.u32 %s1378_s19, 4  ;;  %s1240_s17 = int_to_ptr.vmem [resolvable:$false] %s1239_s17 }
 0x2df   : > { %p1237_p0 = pnand %p1236_p2, %p1854_p4  ;;  %s1241_s21 = scalar_lea.vmem %s1240_s17, 128 }
 0x2e0   : > { %p1242_p3 = scmp.lt.s32.totalorder %s1748_s24, %s1240_s17  ;;  %p1243_p8 = scmp.lt.s32.totalorder %s1241_s21, %s1235_s12 }
 0x2e1   : > { %s1853_s26 = smov %s1852_s14  ;;  %s1746_s20 = scalar_lea.hbm %s1852_s14, %s1072_s18 }
 0x2e2   : > { %p1238_p1 = pneg %p1237_p0  ;;  %p1244_p10 = por %p1243_p8, %p1242_p3 }
 0x2e4   : > { %p1245_p11 = pnand %p1244_p10, %p1238_p1 }
 0x32a   : > { %v785_v28 = vpop.permute.xlu1 %784 }
 0x32e   : > { %v793_v29 = vpop.permute.xlu1 %792 }
 0x32f   : > { %v787_v30 = vpop.permute.xlu0 %786 }
 0x330   : > { %v788_v31 = vsel %vm523_vm3, %v785_v28, %v787_v30 }
 0x331   : > { %864 = vmatpush1.bf16.msra.mxu1 %v788_v31 }
 0x332   : > { %865 = vmatprep.subr.bf16.mxu1 %v1374_v4 }
 0x333   : > { %v795_v32 = vpop.permute.xlu0 %794  ;;  %v801_v33 = vpop.permute.xlu1 %800 }
 0x334   : > { %v796_v34 = vsel %vm539_vm6, %v793_v29, %v795_v32 }
 0x335   : > { %866 = vmatpush1.bf16.msra.mxu1 %v796_v34 }
 0x336   : > { %867 = vmatprep.subr.bf16.mxu1 %v1374_v4 }
 0x337   : > { %v803_v35 = vpop.permute.xlu0 %802  ;;  %v807_v36 = vpop.permute.xlu1 %806 }
 0x338   : > { %v804_v37 = vsel %vm555_vm7, %v801_v33, %v803_v35 }
 0x339   : > { %868 = vmatpush1.bf16.msra.mxu1 %v804_v37 }
 0x33a   : > { %869 = vmatprep.subr.bf16.mxu1 %v1374_v4 }
 0x33b   : > { %v809_v38 = vpop.permute.xlu0 %808  ;;  %v815_v39 = vpop.permute.xlu1 %814 }
 0x33c   : > { %v810_v40 = vsel %vm563_vm8, %v807_v36, %v809_v38 }
 0x33d   : > { %870 = vmatpush1.bf16.msra.mxu1 %v810_v40 }
 0x33e   : > { %871 = vmatprep.subr.bf16.mxu1 %v1374_v4 }
 0x33f   : > { %v817_v41 = vpop.permute.xlu0 %816  ;;  %v823_v42 = vpop.permute.xlu1 %822 }
 0x340   : > { %v818_v43 = vsel %vm579_vm9, %v815_v39, %v817_v41 }
 0x341   : > { %872 = vmatpush1.bf16.msra.mxu1 %v818_v43 }
 0x342   : > { %873 = vmatprep.subr.bf16.mxu1 %v1374_v4 }
 0x343   : > { %v825_v44 = vpop.permute.xlu0 %824  ;;  %v829_v46 = vpop.permute.xlu1 %828 }
 0x344   : > { %v826_v45 = vsel %vm595_vm10, %v823_v42, %v825_v44 }
 0x345   : > { %874 = vmatpush1.bf16.msra.mxu1 %v826_v45 }
 0x346   : > { %875 = vmatprep.subr.bf16.mxu1 %v1374_v4 }
 0x347   : > { %v831_v47 = vpop.permute.xlu0 %830  ;;  %v837_v49 = vpop.permute.xlu1 %836 }
 0x348   : > { %v832_v48 = vsel %vm603_vm11, %v829_v46, %v831_v47 }
 0x349   : > { %876 = vmatpush1.bf16.msra.mxu1 %v832_v48 }
 0x34a   : > { %877 = vmatprep.subr.bf16.mxu1 %v1374_v4  ;;  %v902_v4 = vunpack.c.l.bf16 %v901_v52 }
 0x34b   : > { %v839_v50 = vpop.permute.xlu0 %838 }
 0x34c   : > { %v840_v51 = vsel %vm619_vm12, %v837_v49, %v839_v50 }
 0x34d   : > { %878 = vmatpush1.bf16.msra.mxu1 %v840_v51 }
 0x350   : > { %894 = vmatmul.mubr.bf16.vlgmr.msra.gmra.mrb[0].mxu1 %v1068_v21 }
 0x358   : > { %v846_v53 = vpop.permute.xlu1 %845 }
 0x423   : > { %v895_v54 = vpop.f32.mrb[0].mxu1 }
 0x424   : > { %v896_v55 = vadd.f32 %v895_v54, %v846_v53  ;;  %v897_v56 = vpop.f32.mrb[1].mxu1 }
 0x425   : > { %v898_v3 = vpop.f32.mrb[2].mxu1 }
 0x426   : > { %v903_v57 = vadd.f32 %v902_v4, %v896_v55  ;;  %v899_v58 = vpop.f32.mrb[3].mxu1 }
 0x428   : > { %v904_v59 = vmax.f32 %v903_v57, 0.0 }
 0x42a   : > { %905 = vst [vmem:[%s373_s23] sm:$0xf] %v904_v59 }
 0x42b   : > { %1248 = shalt.err (!%p1245_p11)
}
 0x42c   : > { %s1249_s16 = scalar_lea.hbm %s1746_s20, 64  ;;  %s1253_s23 = scalar_lea.hbm %s1853_s26, 256 }
 0x42d   : > { %p1250_p13 = scmp.ne.s32.totalorder %s1746_s20, %s1249_s16  ;;  %p1254_p9 = scmp.lt.u32.totalorder %s1746_s20, %s1853_s26 }
 0x42e   : > { %p1255_p7 = scmp.lt.u32.totalorder %s1253_s23, %s1249_s16  ;;  %p1257_p2 = scmp.lt.u32.totalorder %s1249_s16, %s1746_s20 }
 0x42f   : > { %p1251_p5 = pnand %p1250_p13, %p1854_p4 }
 0x430   : > { %p1256_p12 = por %p1255_p7, %p1254_p9 }
 0x431   : > { %p1252_p6 = pneg %p1251_p5 }
 0x432   : > { %p1258_p0 = por %p1257_p2, %p1256_p12 }
 0x434   : > { %p1259_p1 = pnand %p1258_p0, %p1252_p6 }
 0x436   : > { %1262 = shalt.err (!%p1259_p1)
}
 0x437   : > { %1080 = dma.vmem_to_hbm [thread:$0]  (%p1854_p4), %s1748_s24, 64, %s1746_s20, %s907_s11  }
 0x438 PF: > { %p1091_p3 = scmp.ge.s32.totalorder %s1357_s15, 2  ;;  %s934_s14 = sand.u32 1, %s1317_s27  }
 0x439   : > { %p1855_p8 = scmp.ne.s32.totalorder %s1844_s8, 0  ;;  %s935_s12 = scalar_lea.sflag [#allocation4], %s934_s14 }
 0x43b   : > { %p1087_p10 = pnand %p1091_p3, %p1855_p8 }
 0x43d   : > { %1312 = dma.done.wait (!%p1087_p10), %s935_s12, 64  }
 0x43e   : > { %1314 = vsyncadd (!%p1087_p10), %s935_s12, 4294967232  ;;  %s24_s15 = sadd.s32 1, %s1357_s15   ;;  %s1856_s19 = sld [smem:[#allocation8_spill]] }
 0x43f   : > { %p21_p11 = scmp.ge.s32.totalorder %s24_s15, 6   ;;  %s1857_s10 = sld [smem:[#allocation13_spill]] }
 0x440   : > { %s1858_s11 = sld [smem:[#allocation9_spill]]  ;;  %s1859_s12 = sld [smem:[#allocation10_spill]] }
 0x441   : > { %s1860_s24 = sld [smem:[#allocation11_spill]]  ;;  %s1861_s14 = sld [smem:[#allocation12_spill]] }
 0x442   : > { %s1862_s27 = smov %s1321_s28  ;;  %s1863_s28 = smov %s1325_s29 }
 0x443   : > { %s1864_s29 = smov %s1514_s13  ;;  %s1865_s30 = smov %s1333_s9 }
 0x444   : > { %s1866_s9 = smov %s1856_s19  ;;  %23 = sbr.rel (!%p21_p11) target bundleno = 11 (0xb), region = 104 }
 0x447   : > { %s1867_s13 = smov %s1860_s24 }
 0x44b   :  { %940 = vsyncpa [#allocation3], 1 }
 0x44c   :  { %942 = vsyncpa [#allocation3 + $0x1], 1 }
 0x44d   :  { %943 = vsyncpa [#allocation4], 1 }
 0x44e   :  { %945 = vsyncpa [#allocation4 + $0x1], 1 }

</bundles_post_ra>
